<compile_context>
chip_gen: v5e
topology: v5e:2x2
jax: 0.10.0
libtpu: 0.0.40
codegen_flags: <defaults>
</compile_context>

<pallas_src>
import jax
import jax.numpy as jnp
from jax.experimental import pallas as pl
from jax.experimental.pallas import tpu as pltpu


# ----------------------------- fused kernel ---------------------------------

def _make_fused_se_kernel(num_levels, inv_hw):
    """Build the fused SE kernel for `num_levels` FPN levels.

    Ref layout per grid step (one batch element):
      refs[0:L]    x_k  : (1, C_k, HW_k)  feature level k
      refs[L:2L]   w1_k : (C_k, Cr)       row-block k of W1^T
      refs[2L:3L]  w2_k : (Cr, C_k)       column-block k of W2^T
      refs[3L:4L]  o_k  : (1, C_k, HW_k)  rescaled output level k
    """
    inv_hw = tuple(float(v) for v in inv_hw)

    def kernel(*refs):
        x_refs = refs[0:num_levels]
        w1_refs = refs[num_levels:2 * num_levels]
        w2_refs = refs[2 * num_levels:3 * num_levels]
        o_refs = refs[3 * num_levels:4 * num_levels]

        # One VMEM read per level; reused for both the pool and the rescale.
        xs = [x_ref[...] for x_ref in x_refs]

        # Squeeze: global average pool = f32 sum * precomputed 1/(H*W).
        pooled = [
            jnp.sum(x.astype(jnp.float32), axis=-1) * inv       # (1, C_k)
            for x, inv in zip(xs, inv_hw)
        ]

        # Excitation, first linear + ReLU, as a sum of per-level partial
        # matmuls (== concat(pooled) @ W1^T, without any in-kernel concat).
        h = jnp.dot(pooled[0], w1_refs[0][...], preferred_element_type=jnp.float32)
        for p, w1_ref in zip(pooled[1:], w1_refs[1:]):
            h = h + jnp.dot(p, w1_ref[...], preferred_element_type=jnp.float32)
        h = jnp.maximum(h, 0.0)                                  # ReLU, (1, Cr)

        # Second linear + Sigmoid per level (column block of W2^T), then
        # rescale that level.  The gate stays in vregs and never hits HBM.
        for x, w2_ref, o_ref in zip(xs, w2_refs, o_refs):
            z = jnp.dot(h, w2_ref[...], preferred_element_type=jnp.float32)
            y = 1.0 / (1.0 + jnp.exp(-z))                        # Sigmoid, (1, C_k)
            o_ref[...] = (x * y[:, :, None]).astype(o_ref.dtype)

    return kernel


# ----------------------------- parameter setup -------------------------------

def init_se_block_fpn_params(w1, w2, level_channels):
    """One-time conversion of PyTorch nn.Linear weights to kernel layout.

    w1: (channels // reduction, channels)  -- torch layout (out_features, in_features)
    w2: (channels, channels // reduction)
    level_channels: per-FPN-level channel counts; must sum to `channels`.

    Returns (w1_blocks, w2_blocks): per-level (C_k, Cr) / (Cr, C_k) blocks of
    W1^T / W2^T.  Doing the transpose + split here keeps the forward path free
    of XLA transpose/slice ops.
    """
    w1_t = jnp.asarray(w1).T     # (channels, hidden)
    w2_t = jnp.asarray(w2).T     # (hidden, channels)
    channels = w1_t.shape[0]
    if sum(level_channels) != channels or w2_t.shape[1] != channels:
        raise ValueError("sum(level_channels) must equal the SE block `channels`")
    w1_blocks, w2_blocks, cur = [], [], 0
    for ck in level_channels:
        w1_blocks.append(w1_t[cur:cur + ck, :])
        w2_blocks.append(w2_t[:, cur:cur + ck])
        cur += ck
    return tuple(w1_blocks), tuple(w2_blocks)


# ----------------------------- forward --------------------------------------

def se_block_fpn(features, w1_blocks, w2_blocks):
    """Fused Pallas implementation of SEBlockFPN.forward.

    features:  list of (B, C_k, H_k, W_k) arrays with sum(C_k) == channels.
    w1_blocks / w2_blocks: output of init_se_block_fpn_params.
    Returns a list of arrays with the same shapes as `features`.
    """
    num_levels = len(features)
    assert len(w1_blocks) == num_levels and len(w2_blocks) == num_levels
    B = features[0].shape[0]
    for f, w1b, w2b in zip(features, w1_blocks, w2_blocks):
        assert f.shape[0] == B
        assert w1b.shape[0] == f.shape[1] and w2b.shape[1] == f.shape[1]

    # (B, C, H, W) -> (B, C, H*W): free relabel of contiguous NCHW data.
    xs = [f.reshape(f.shape[0], f.shape[1], f.shape[2] * f.shape[3]) for f in features]
    inv_hw = [1.0 / (f.shape[2] * f.shape[3]) for f in features]

    kernel = _make_fused_se_kernel(num_levels, inv_hw)

    def feat_spec(c, hw):
        return pl.BlockSpec((1, c, hw), lambda b: (b, 0, 0))

    def weight_spec(shape):
        return pl.BlockSpec(shape, lambda b: (0, 0))

    in_specs = (
        [feat_spec(x.shape[1], x.shape[2]) for x in xs]
        + [weight_spec(w.shape) for w in w1_blocks]
        + [weight_spec(w.shape) for w in w2_blocks]
    )
    out_specs = tuple(feat_spec(x.shape[1], x.shape[2]) for x in xs)
    out_shape = tuple(jax.ShapeDtypeStruct(x.shape, x.dtype) for x in xs)

    outs3 = pl.pallas_call(
        kernel,
        grid=(B,),
        out_shape=out_shape,
        in_specs=in_specs,
        out_specs=out_specs,
        compiler_params=pltpu.CompilerParams(dimension_semantics=("parallel",)),
    )(*xs, *w1_blocks, *w2_blocks)

    return [o.reshape(f.shape) for o, f in zip(outs3, features)]


# ----------------------------- reference ------------------------------------

def se_block_fpn_ref(features, w1, w2):
    pooled = [jnp.mean(f, axis=(2, 3)) for f in features]
    m = jnp.concatenate(pooled, axis=1)
    h = jnp.maximum(m @ w1.T, 0.0)
    y = jax.nn.sigmoid(h @ w2.T)
    outs, cur = [], 0
    for f in features:
        ck = f.shape[1]
        outs.append(f * y[:, cur:cur + ck, None, None])
        cur += ck
    return outs


# ----------------------------- main -----------------------------------------

if __name__ == "__main__":
    key = jax.random.PRNGKey(0)
    k_f1, k_f2, k_f3, k_w1, k_w2 = jax.random.split(key, 5)

    # 3 FPN levels, batch=2, channels 8 + 8 + 16 = 32, reduction=8 -> hidden=4
    B = 2
    channels = 32
    reduction = 8
    hidden = channels // reduction

    f1 = jax.random.normal(k_f1, (B, 8, 16, 16), dtype=jnp.float32)
    f2 = jax.random.normal(k_f2, (B, 8, 8, 8), dtype=jnp.float32)
    f3 = jax.random.normal(k_f3, (B, 16, 4, 4), dtype=jnp.float32)
    features = [f1, f2, f3]
    level_channels = [f.shape[1] for f in features]

    # Deterministic synthetic weights (PyTorch nn.Linear layout: (out, in)).
    w1 = jax.random.normal(k_w1, (hidden, channels), dtype=jnp.float32) * 0.1
    w2 = jax.random.normal(k_w2, (channels, hidden), dtype=jnp.float32) * 0.1

    # One-time parameter prep (transpose + per-level split), outside forward.
    w1_blocks, w2_blocks = init_se_block_fpn_params(w1, w2, level_channels)

    outs = se_block_fpn(features, w1_blocks, w2_blocks)
    outs = [jax.block_until_ready(o) for o in outs]

    refs = se_block_fpn_ref(features, w1, w2)
    for o, r in zip(outs, refs):
        assert o.shape == r.shape and o.dtype == r.dtype
        assert jnp.allclose(o, r, atol=1e-5, rtol=1e-5), "mismatch vs reference"

    print("KERNEL_OK")
</pallas_src>

<mosaic_0001>
module attributes {stable_mosaic.version = 11 : i64} {
  func.func @kernel(%arg0: i32, %arg1: memref<1x8x256xf32, #tpu.memory_space<vmem>>, %arg2: memref<1x8x64xf32, #tpu.memory_space<vmem>>, %arg3: memref<1x16x16xf32, #tpu.memory_space<vmem>>, %arg4: memref<8x4xf32, #tpu.memory_space<vmem>>, %arg5: memref<8x4xf32, #tpu.memory_space<vmem>>, %arg6: memref<16x4xf32, #tpu.memory_space<vmem>>, %arg7: memref<4x8xf32, #tpu.memory_space<vmem>>, %arg8: memref<4x8xf32, #tpu.memory_space<vmem>>, %arg9: memref<4x16xf32, #tpu.memory_space<vmem>>, %arg10: memref<1x8x256xf32, #tpu.memory_space<vmem>>, %arg11: memref<1x8x64xf32, #tpu.memory_space<vmem>>, %arg12: memref<1x16x16xf32, #tpu.memory_space<vmem>>) attributes {dimension_semantics = [#tpu.dimension_semantics<parallel>], iteration_bounds = array<i64: 2>, scalar_prefetch = 0 : i64, scratch_operands = 0 : i64, tpu.core_type = #tpu.core_type<tc>, window_params = [{transform_indices = @transform_0, window_bounds = array<i64: 1, 8, 256>}, {transform_indices = @transform_1, window_bounds = array<i64: 1, 8, 64>}, {transform_indices = @transform_2, window_bounds = array<i64: 1, 16, 16>}, {pipeline_mode = #tpu.pipeline_mode<synchronous>, transform_indices = @transform_3, window_bounds = array<i64: 8, 4>}, {pipeline_mode = #tpu.pipeline_mode<synchronous>, transform_indices = @transform_4, window_bounds = array<i64: 8, 4>}, {pipeline_mode = #tpu.pipeline_mode<synchronous>, transform_indices = @transform_5, window_bounds = array<i64: 16, 4>}, {pipeline_mode = #tpu.pipeline_mode<synchronous>, transform_indices = @transform_6, window_bounds = array<i64: 4, 8>}, {pipeline_mode = #tpu.pipeline_mode<synchronous>, transform_indices = @transform_7, window_bounds = array<i64: 4, 8>}, {pipeline_mode = #tpu.pipeline_mode<synchronous>, transform_indices = @transform_8, window_bounds = array<i64: 4, 16>}, {transform_indices = @transform_9, window_bounds = array<i64: 1, 8, 256>}, {transform_indices = @transform_10, window_bounds = array<i64: 1, 8, 64>}, {transform_indices = @transform_11, window_bounds = array<i64: 1, 16, 16>}]} {
    %c0 = arith.constant 0 : index
    %c0_0 = arith.constant 0 : index
    %c0_1 = arith.constant 0 : index
    %0 = vector.load %arg1[%c0, %c0_0, %c0_1] : memref<1x8x256xf32, #tpu.memory_space<vmem>>, vector<1x8x256xf32>
    %c0_2 = arith.constant 0 : index
    %c0_3 = arith.constant 0 : index
    %c0_4 = arith.constant 0 : index
    %1 = vector.load %arg2[%c0_2, %c0_3, %c0_4] : memref<1x8x64xf32, #tpu.memory_space<vmem>>, vector<1x8x64xf32>
    %c0_5 = arith.constant 0 : index
    %c0_6 = arith.constant 0 : index
    %c0_7 = arith.constant 0 : index
    %2 = vector.load %arg3[%c0_5, %c0_6, %c0_7] : memref<1x16x16xf32, #tpu.memory_space<vmem>>, vector<1x16x16xf32>
    %cst = arith.constant dense<0.000000e+00> : vector<1x8xf32>
    %3 = vector.multi_reduction <add>, %0, %cst [2] : vector<1x8x256xf32> to vector<1x8xf32>
    %cst_8 = arith.constant 3.906250e-03 : f32
    %4 = vector.broadcast %cst_8 : f32 to vector<1x8xf32>
    %5 = arith.mulf %3, %4 : vector<1x8xf32>
    %cst_9 = arith.constant dense<0.000000e+00> : vector<1x8xf32>
    %6 = vector.multi_reduction <add>, %1, %cst_9 [2] : vector<1x8x64xf32> to vector<1x8xf32>
    %cst_10 = arith.constant 1.562500e-02 : f32
    %7 = vector.broadcast %cst_10 : f32 to vector<1x8xf32>
    %8 = arith.mulf %6, %7 : vector<1x8xf32>
    %cst_11 = arith.constant dense<0.000000e+00> : vector<1x16xf32>
    %9 = vector.multi_reduction <add>, %2, %cst_11 [2] : vector<1x16x16xf32> to vector<1x16xf32>
    %cst_12 = arith.constant 6.250000e-02 : f32
    %10 = vector.broadcast %cst_12 : f32 to vector<1x16xf32>
    %11 = arith.mulf %9, %10 : vector<1x16xf32>
    %c0_13 = arith.constant 0 : index
    %c0_14 = arith.constant 0 : index
    %12 = vector.load %arg4[%c0_13, %c0_14] : memref<8x4xf32, #tpu.memory_space<vmem>>, vector<8x4xf32>
    %cst_15 = arith.constant dense<0.000000e+00> : vector<1x4xf32>
    %13 = tpu.matmul %5, %12, %cst_15 {dimension_numbers = #tpu.dot_dimension_numbers<[1], [0], [0], [1], [0, 0, 1, 1], [], []>} : vector<1x8xf32>, vector<8x4xf32>, vector<1x4xf32> -> vector<1x4xf32>
    %c0_16 = arith.constant 0 : index
    %c0_17 = arith.constant 0 : index
    %14 = vector.load %arg5[%c0_16, %c0_17] : memref<8x4xf32, #tpu.memory_space<vmem>>, vector<8x4xf32>
    %cst_18 = arith.constant dense<0.000000e+00> : vector<1x4xf32>
    %15 = tpu.matmul %8, %14, %cst_18 {dimension_numbers = #tpu.dot_dimension_numbers<[1], [0], [0], [1], [0, 0, 1, 1], [], []>} : vector<1x8xf32>, vector<8x4xf32>, vector<1x4xf32> -> vector<1x4xf32>
    %16 = arith.addf %13, %15 : vector<1x4xf32>
    %c0_19 = arith.constant 0 : index
    %c0_20 = arith.constant 0 : index
    %17 = vector.load %arg6[%c0_19, %c0_20] : memref<16x4xf32, #tpu.memory_space<vmem>>, vector<16x4xf32>
    %cst_21 = arith.constant dense<0.000000e+00> : vector<1x4xf32>
    %18 = tpu.matmul %11, %17, %cst_21 {dimension_numbers = #tpu.dot_dimension_numbers<[1], [0], [0], [1], [0, 0, 1, 1], [], []>} : vector<1x16xf32>, vector<16x4xf32>, vector<1x4xf32> -> vector<1x4xf32>
    %19 = arith.addf %16, %18 : vector<1x4xf32>
    %cst_22 = arith.constant 0.000000e+00 : f32
    %20 = vector.broadcast %cst_22 : f32 to vector<1x4xf32>
    %21 = arith.maximumf %19, %20 : vector<1x4xf32>
    %c0_23 = arith.constant 0 : index
    %c0_24 = arith.constant 0 : index
    %22 = vector.load %arg7[%c0_23, %c0_24] : memref<4x8xf32, #tpu.memory_space<vmem>>, vector<4x8xf32>
    %cst_25 = arith.constant dense<0.000000e+00> : vector<1x8xf32>
    %23 = tpu.matmul %21, %22, %cst_25 {dimension_numbers = #tpu.dot_dimension_numbers<[1], [0], [0], [1], [0, 0, 1, 1], [], []>} : vector<1x4xf32>, vector<4x8xf32>, vector<1x8xf32> -> vector<1x8xf32>
    %cst_26 = arith.constant 0.000000e+00 : f32
    %24 = vector.broadcast %cst_26 : f32 to vector<1x8xf32>
    %25 = arith.subf %24, %23 : vector<1x8xf32>
    %26 = math.exp %25 : vector<1x8xf32>
    %cst_27 = arith.constant 1.000000e+00 : f32
    %27 = vector.broadcast %cst_27 : f32 to vector<1x8xf32>
    %28 = arith.addf %27, %26 : vector<1x8xf32>
    %cst_28 = arith.constant 1.000000e+00 : f32
    %29 = vector.broadcast %cst_28 : f32 to vector<1x8xf32>
    %30 = arith.divf %29, %28 : vector<1x8xf32>
    %31 = vector.shape_cast %30 : vector<1x8xf32> to vector<1x8x1xf32>
    %32 = vector.broadcast %31 : vector<1x8x1xf32> to vector<1x8x256xf32>
    %33 = arith.mulf %0, %32 : vector<1x8x256xf32>
    %c0_29 = arith.constant 0 : index
    %c0_30 = arith.constant 0 : index
    %c0_31 = arith.constant 0 : index
    %34 = vector.load %arg10[%c0_29, %c0_30, %c0_31] : memref<1x8x256xf32, #tpu.memory_space<vmem>>, vector<1x8x256xf32>
    tpu.vector_store %arg10[%c0_29, %c0_30, %c0_31], %33 {strides = array<i32>} : memref<1x8x256xf32, #tpu.memory_space<vmem>>, vector<1x8x256xf32>,
    %c0_32 = arith.constant 0 : index
    %c0_33 = arith.constant 0 : index
    %35 = vector.load %arg8[%c0_32, %c0_33] : memref<4x8xf32, #tpu.memory_space<vmem>>, vector<4x8xf32>
    %cst_34 = arith.constant dense<0.000000e+00> : vector<1x8xf32>
    %36 = tpu.matmul %21, %35, %cst_34 {dimension_numbers = #tpu.dot_dimension_numbers<[1], [0], [0], [1], [0, 0, 1, 1], [], []>} : vector<1x4xf32>, vector<4x8xf32>, vector<1x8xf32> -> vector<1x8xf32>
    %cst_35 = arith.constant 0.000000e+00 : f32
    %37 = vector.broadcast %cst_35 : f32 to vector<1x8xf32>
    %38 = arith.subf %37, %36 : vector<1x8xf32>
    %39 = math.exp %38 : vector<1x8xf32>
    %cst_36 = arith.constant 1.000000e+00 : f32
    %40 = vector.broadcast %cst_36 : f32 to vector<1x8xf32>
    %41 = arith.addf %40, %39 : vector<1x8xf32>
    %cst_37 = arith.constant 1.000000e+00 : f32
    %42 = vector.broadcast %cst_37 : f32 to vector<1x8xf32>
    %43 = arith.divf %42, %41 : vector<1x8xf32>
    %44 = vector.shape_cast %43 : vector<1x8xf32> to vector<1x8x1xf32>
    %45 = vector.broadcast %44 : vector<1x8x1xf32> to vector<1x8x64xf32>
    %46 = arith.mulf %1, %45 : vector<1x8x64xf32>
    %c0_38 = arith.constant 0 : index
    %c0_39 = arith.constant 0 : index
    %c0_40 = arith.constant 0 : index
    %47 = vector.load %arg11[%c0_38, %c0_39, %c0_40] : memref<1x8x64xf32, #tpu.memory_space<vmem>>, vector<1x8x64xf32>
    tpu.vector_store %arg11[%c0_38, %c0_39, %c0_40], %46 {strides = array<i32>} : memref<1x8x64xf32, #tpu.memory_space<vmem>>, vector<1x8x64xf32>,
    %c0_41 = arith.constant 0 : index
    %c0_42 = arith.constant 0 : index
    %48 = vector.load %arg9[%c0_41, %c0_42] : memref<4x16xf32, #tpu.memory_space<vmem>>, vector<4x16xf32>
    %cst_43 = arith.constant dense<0.000000e+00> : vector<1x16xf32>
    %49 = tpu.matmul %21, %48, %cst_43 {dimension_numbers = #tpu.dot_dimension_numbers<[1], [0], [0], [1], [0, 0, 1, 1], [], []>} : vector<1x4xf32>, vector<4x16xf32>, vector<1x16xf32> -> vector<1x16xf32>
    %cst_44 = arith.constant 0.000000e+00 : f32
    %50 = vector.broadcast %cst_44 : f32 to vector<1x16xf32>
    %51 = arith.subf %50, %49 : vector<1x16xf32>
    %52 = math.exp %51 : vector<1x16xf32>
    %cst_45 = arith.constant 1.000000e+00 : f32
    %53 = vector.broadcast %cst_45 : f32 to vector<1x16xf32>
    %54 = arith.addf %53, %52 : vector<1x16xf32>
    %cst_46 = arith.constant 1.000000e+00 : f32
    %55 = vector.broadcast %cst_46 : f32 to vector<1x16xf32>
    %56 = arith.divf %55, %54 : vector<1x16xf32>
    %57 = vector.shape_cast %56 : vector<1x16xf32> to vector<1x16x1xf32>
    %58 = vector.broadcast %57 : vector<1x16x1xf32> to vector<1x16x16xf32>
    %59 = arith.mulf %2, %58 : vector<1x16x16xf32>
    %c0_47 = arith.constant 0 : index
    %c0_48 = arith.constant 0 : index
    %c0_49 = arith.constant 0 : index
    %60 = vector.load %arg12[%c0_47, %c0_48, %c0_49] : memref<1x16x16xf32, #tpu.memory_space<vmem>>, vector<1x16x16xf32>
    tpu.vector_store %arg12[%c0_47, %c0_48, %c0_49], %59 {strides = array<i32>} : memref<1x16x16xf32, #tpu.memory_space<vmem>>, vector<1x16x16xf32>,
    return
  }
  func.func @transform_0(%arg0: i32) -> (i32, i32, i32) {
    %c0_i32 = arith.constant 0 : i32
    %c0_i32_0 = arith.constant 0 : i32
    %c0_i32_1 = arith.constant 0 : i32
    return %arg0, %c0_i32, %c0_i32_0 : i32, i32, i32
  }
  func.func @transform_1(%arg0: i32) -> (i32, i32, i32) {
    %c0_i32 = arith.constant 0 : i32
    %c0_i32_0 = arith.constant 0 : i32
    %c0_i32_1 = arith.constant 0 : i32
    return %arg0, %c0_i32, %c0_i32_0 : i32, i32, i32
  }
  func.func @transform_2(%arg0: i32) -> (i32, i32, i32) {
    %c0_i32 = arith.constant 0 : i32
    %c0_i32_0 = arith.constant 0 : i32
    %c0_i32_1 = arith.constant 0 : i32
    return %arg0, %c0_i32, %c0_i32_0 : i32, i32, i32
  }
  func.func @transform_3(%arg0: i32) -> (i32, i32) {
    %c0_i32 = arith.constant 0 : i32
    %c0_i32_0 = arith.constant 0 : i32
    %c0_i32_1 = arith.constant 0 : i32
    return %c0_i32, %c0_i32_0 : i32, i32
  }
  func.func @transform_4(%arg0: i32) -> (i32, i32) {
    %c0_i32 = arith.constant 0 : i32
    %c0_i32_0 = arith.constant 0 : i32
    %c0_i32_1 = arith.constant 0 : i32
    return %c0_i32, %c0_i32_0 : i32, i32
  }
  func.func @transform_5(%arg0: i32) -> (i32, i32) {
    %c0_i32 = arith.constant 0 : i32
    %c0_i32_0 = arith.constant 0 : i32
    %c0_i32_1 = arith.constant 0 : i32
    return %c0_i32, %c0_i32_0 : i32, i32
  }
  func.func @transform_6(%arg0: i32) -> (i32, i32) {
    %c0_i32 = arith.constant 0 : i32
    %c0_i32_0 = arith.constant 0 : i32
    %c0_i32_1 = arith.constant 0 : i32
    return %c0_i32, %c0_i32_0 : i32, i32
  }
  func.func @transform_7(%arg0: i32) -> (i32, i32) {
    %c0_i32 = arith.constant 0 : i32
    %c0_i32_0 = arith.constant 0 : i32
    %c0_i32_1 = arith.constant 0 : i32
    return %c0_i32, %c0_i32_0 : i32, i32
  }
  func.func @transform_8(%arg0: i32) -> (i32, i32) {
    %c0_i32 = arith.constant 0 : i32
    %c0_i32_0 = arith.constant 0 : i32
    %c0_i32_1 = arith.constant 0 : i32
    return %c0_i32, %c0_i32_0 : i32, i32
  }
  func.func @transform_9(%arg0: i32) -> (i32, i32, i32) {
    %c0_i32 = arith.constant 0 : i32
    %c0_i32_0 = arith.constant 0 : i32
    %c0_i32_1 = arith.constant 0 : i32
    return %arg0, %c0_i32, %c0_i32_0 : i32, i32, i32
  }
  func.func @transform_10(%arg0: i32) -> (i32, i32, i32) {
    %c0_i32 = arith.constant 0 : i32
    %c0_i32_0 = arith.constant 0 : i32
    %c0_i32_1 = arith.constant 0 : i32
    return %arg0, %c0_i32, %c0_i32_0 : i32, i32, i32
  }
  func.func @transform_11(%arg0: i32) -> (i32, i32, i32) {
    %c0_i32 = arith.constant 0 : i32
    %c0_i32_0 = arith.constant 0 : i32
    %c0_i32_1 = arith.constant 0 : i32
    return %arg0, %c0_i32, %c0_i32_0 : i32, i32, i32
  }
}

</mosaic_0001>

<bundles_post_ra>
// kernel: tpu_custom_call.1
= control target key start
LH: loop header
LB: loop body
LE: loop exit
PB: predicated region body
PF: predicated region fallthrough
CT: control target
= control target key end

     0   :  { %s1624_s0 = inlined_call_operand.hbm [shape: f32[2,8,256], index: 0, kind: input, shape index: {}]   ;;  %s1625_s1 = inlined_call_operand.vmem [shape: f32[2,8,64], index: 1, kind: input, shape index: {}]   ;;  %s1626_s2 = inlined_call_operand.hbm [shape: f32[2,16,16], index: 2, kind: input, shape index: {}]   ;;  %s1627_s3 = inlined_call_operand.vmem [shape: f32[8,4], index: 3, kind: input, shape index: {}]   ;;  %s1628_s4 = inlined_call_operand.vmem [shape: f32[8,4], index: 4, kind: input, shape index: {}]   ;;  %s1629_s5 = inlined_call_operand.vmem [shape: f32[16,4], index: 5, kind: input, shape index: {}]   ;;  %s1630_s6 = inlined_call_operand.vmem [shape: f32[4,8], index: 6, kind: input, shape index: {}]   ;;  %s1631_s7 = inlined_call_operand.vmem [shape: f32[4,8], index: 7, kind: input, shape index: {}]   ;;  %s1632_s8 = inlined_call_operand.vmem [shape: f32[4,16], index: 8, kind: input, shape index: {}]   ;;  %s1633_s9 = inlined_call_operand.hbm [shape: f32[2,8,256], index: 9, kind: output, shape index: {0}]   ;;  %s1634_s10 = inlined_call_operand.hbm [shape: f32[2,8,64], index: 10, kind: output, shape index: {1}]   ;;  %s1635_s11 = inlined_call_operand.hbm [shape: f32[2,16,16], index: 11, kind: output, shape index: {2}]  }
   0x1   :  { %1644 = sst [smem:[#allocation20_spill]] %s1624_s0 }
   0x2   :  { %1645 = sst [smem:[#allocation21_spill]] %s1625_s1 }
   0x3   :  { %1646 = sst [smem:[#allocation22_spill]] %s1626_s2 }
   0x4   :  { %1647 = sst [smem:[#allocation23_spill]] %s1633_s9 }
   0x5   :  { %1648 = sst [smem:[#allocation24_spill]] %s1635_s11 }
   0x6   :  { %17 = vsyncpa [#allocation3], 0 }
   0x7   :  { %19 = vsyncpa [#allocation3 + $0x1], 0 }
   0x8   :  { %20 = vsyncpa [#allocation6], 0 }
   0x9   :  { %22 = vsyncpa [#allocation6 + $0x1], 0 }
   0xa   :  { %23 = vsyncpa [#allocation4], 0 }
   0xb   :  { %25 = vsyncpa [#allocation4 + $0x1], 0 }
   0xc   :  { %26 = vsyncpa [#allocation9], 0 }
   0xd   :  { %28 = vsyncpa [#allocation9 + $0x1], 0  ;;  %s1364_s17 = smov 0   ;;  %s1366_s18 = smov 0  }
   0xe   :  { %s1368_s19 = smov 0   ;;  %s1370_s20 = smov 0  }
   0xf LB: > { %1649 = sst [smem:[#allocation15_spill]] %s1286_s17  ;;  %s1385_s21 = sadd.s32 4294967295, %s1298_s20   ;;  %s1298_s20 = sphi %s1370_s20, %s1669_s20   ;;  %s1294_s19 = sphi %s1368_s19, %s1671_s19   ;;  %s1290_s18 = sphi %s1366_s18, %s1673_s18   ;;  %s1286_s17 = sphi %s1364_s17, %s1672_s17  }
  0x10   : > { %1650 = sst [smem:[#allocation16_spill]] %s1294_s19  ;;  %s1636_s22 = sadd.s32 4294967294, %s1298_s20  }
  0x11   : > { %s1389_s23 = sadd.s32 1, %s1298_s20   ;;  %s41_s24 = sadd.s32 1, %s1294_s19 }
  0x12   : > { %1651 = sst [smem:[#allocation17_spill]] %s1389_s23  ;;  %s38_s25 = ssub.s32 %s1298_s20, %s1389_s23 }
  0x13   : > { %p48_p0 = scmp.ne.s32.totalorder %s1294_s19, %s1290_s18  ;;  %p39_p1 = scmp.eq.s32.totalorder %s38_s25, 0 }
  0x14   : > { %p49_p2 = scmp.eq.s32.totalorder %s1298_s20, 0  ;;  %p54_p3 = scmp.ne.s32.totalorder %s1290_s18, %s1286_s17 }
  0x15   : > { %p55_p4 = scmp.eq.s32.totalorder %s1385_s21, 0  ;;  %p256_p7 = scmp.eq.s32.totalorder %s1385_s21, 1 }
  0x16   : > { %s1401_s26 = scalar_select %p39_p1, %s1294_s19, %s41_s24  }
  0x17   : > { %p1403_p5 = por %p49_p2, %p48_p0  ;;  %p1407_p6 = por %p55_p4, %p54_p3 }
  0x18   : > { %1652 = sst [smem:[#allocation18_spill]] %s1401_s26  ;;  %p262_p8 = scmp.eq.s32.totalorder %s1636_s22, 1 }
  0x19   : > { %p990_p9 = scmp.ge.s32.totalorder %s1298_s20, 2  ;;  %p1054_p10 = scmp.lt.s32.totalorder %s1298_s20, 2 }
  0x1a   : > { %p1416_p11 = por %p256_p7, %p48_p0  ;;  %p1420_p12 = por %p262_p8, %p54_p3 }
  0x1b   : > { %s1425_s12 = sand.u32 1, %s1294_s19   ;;  %s1023_s13 = sshll.u32 %s1298_s20, 4 }
  0x1c   : > { %s1656_s30 = scalar_select %p1420_p12, 1, 0 }
  0x1d   : > { %s991_s14 = sshll.u32 %s1425_s12, 4  ;;  %s1658_s0 = sld [smem:[#allocation20_spill]] }
  0x1e   : > { %1657 = sst [smem:[#allocation19_spill]] %s1656_s30  ;;  %s356_s22 = scalar_lea.vmem [#allocation2], %s991_s14 }
  0x1f   : > { %s365_s26 = sshll.u32 %s356_s22, 4  ;;  %p1434_p13 = pnand %p1054_p10, %p1403_p5  ;;  %s366_s26 = int_to_ptr.vmem [resolvable:$true] %s365_s26 }
  0x20   : > { %s1660_s2 = sld [smem:[#allocation22_spill]]  ;;  %s353_s9 = scalar_lea.sflag [#allocation3], %s1425_s12 }
  0x21   : > { %p1112_p1 = pneg %p1434_p13 }
  0x23   : > { %s361_s24 = scalar_lea.hbm %s1658_s0, %s1023_s13 }
  0x24   : > { %s363_s25 = sshll.u32 %s361_s24, 4  ;;  %s1115_s24 = scalar_lea.hbm %s1658_s0, 32  ;;  %s364_s25 = int_to_ptr.hbm [resolvable:$true] %s363_s25 }
  0x25   : > { %s1108_s15 = sshra.s32 %s364_s25, 4  ;;  %s1109_s15 = int_to_ptr.hbm [resolvable:$true] %s1108_s15 }
  0x26   : > { %s388_s17 = scalar_lea.hbm %s1660_s2, %s1023_s13  ;;  %s1110_s16 = scalar_lea.hbm %s1109_s15, 16 }
  0x27   : > { %s389_s11 = sshll.u32 %s388_s17, 4  ;;  %p1111_p0 = scmp.ne.s32.totalorder %s1109_s15, %s1110_s16  ;;  %s390_s11 = int_to_ptr.hbm [resolvable:$true] %s389_s11 }
  0x28   : > { %p1116_p4 = scmp.lt.s32.totalorder %s1109_s15, %s1658_s0  ;;  %p1117_p5 = scmp.lt.s32.totalorder %s1115_s24, %s1110_s16 }
  0x29   : > { %p1113_p2 = pnand %p1112_p1, %p1111_p0 }
  0x2a   : > { %p1118_p7 = por %p1117_p5, %p1116_p4 }
  0x2b   : > { %p1114_p3 = pneg %p1113_p2 }
  0x2d   : > { %p1119_p8 = pnand %p1118_p7, %p1114_p3 }
  0x2f   : > { %1122 = shalt.err (!%p1119_p8)
}
  0x30   : > { %1040 = dma.hbm_to_vmem [thread:$0]  (!%p1434_p13), %s364_s25, 256, %s366_s26, %s353_s9  }
  0x31   : > { %s383_s17 = scalar_lea.vmem [#allocation5], %s991_s14  ;;  %p997_p10 = scmp.ge.s32.totalorder %s1298_s20, 1 }
  0x32   : > { %s391_s13 = sshll.u32 %s383_s17, 4  ;;  %p399_p0 = scmp.lt.s32.totalorder %s1298_s20, 3  ;;  %s392_s13 = int_to_ptr.vmem [resolvable:$true] %s391_s13 }
  0x33   : > { %s380_s15 = scalar_lea.sflag [#allocation6], %s1425_s12  ;;  %s1138_s16 = sshra.s32 %s390_s11, 4  ;;  %s1139_s16 = int_to_ptr.hbm [resolvable:$true] %s1138_s16 }
  0x34   : > { %p1457_p2 = pnand %p997_p10, %p399_p0  ;;  %s1140_s27 = scalar_lea.hbm %s1139_s16, 16 }
  0x35   : > { %p1141_p3 = scmp.ne.s32.totalorder %s1139_s16, %s1140_s27  ;;  %s1145_s14 = scalar_lea.hbm %s1660_s2, 32 }
  0x36   : > { %p1146_p7 = scmp.lt.s32.totalorder %s1139_s16, %s1660_s2  ;;  %p1147_p8 = scmp.lt.s32.totalorder %s1145_s14, %s1140_s27 }
  0x37   : > { %p1143_p4 = pnand %p1141_p3, %p1112_p1 }
  0x38   : > { %p1148_p10 = por %p1147_p8, %p1146_p7 }
  0x39   : > { %p1144_p5 = pneg %p1143_p4 }
  0x3b   : > { %p1149_p0 = pnand %p1148_p10, %p1144_p5 }
  0x3d   : > { %1152 = shalt.err (!%p1149_p0)
}
  0x3e   : > { %s1300_s12 = smov 128   ;;  %s1301_s19 = smov 8  }
  0x3f   : > { %1043 = dma.hbm_to_vmem [thread:$0]  (!%p1434_p13), %s390_s11, 256, %s392_s13, %s380_s15, %s1300_s12, %s1300_s12, %s1301_s19  }
  0x40   : > { %403 = sbr.rel (%p1457_p2) target bundleno = 628 (0x274), region = 56  ;;  %s1476_s30 = sand.u32 (!%p1457_p2), 1, %s1290_s18  }
  0x41   : > { %s1479_s17 = sshll.u32 (!%p1457_p2), %s1476_s30, 4  ;;  %s406_s16 = scalar_lea.sflag (!%p1457_p2), [#allocation3], %s1476_s30 }
  0x42   : > { %s409_s27 = scalar_lea.vmem (!%p1457_p2), [#allocation2], %s1479_s17 }
  0x45   : > { %1269 = dma.done.wait (%p1407_p6), %s406_s16, 256  }
  0x46   : > { %1271 = vsyncadd (%p1407_p6), %s406_s16, 4294967040  ;;  %s416_s11 = scalar_lea.sflag [#allocation6], %s1476_s30  ;;  %s419_s23 = scalar_lea.vmem [#allocation5], %s1479_s17 }
  0x47   : > { %1273 = dma.done.wait (%p1407_p6), %s416_s11, 256  }
  0x48   : > { %1275 = vsyncadd (%p1407_p6), %s416_s11, 4294967040  ;;  %p478_p13 = scmp.lt.s32.totalorder %s1385_s21, 1  ;;  %vm496_vm0 = vcmask 130048   ;;  %v1495_v0 = vld [vmem:[%s419_s23] sm:$0xff]  ;;  %v1499_v2 = vld [vmem:[%s409_s27 + $0x8] sm:$0xff]  ;;  %s1662_s1 = sld [smem:[#allocation21_spill]]  ;;  %v508_v13 = vlaneseq }
  0x49   : > { %v1497_v1 = vld [vmem:[%s409_s27] sm:$0xff]  ;;  %v497_v3 = vsel %vm496_vm0, %v1495_v0, 0.0  ;;  %v1508_v5 = vld [vmem:[%s419_s23 + $0x8] sm:$0xff]  ;;  %vm491_vm1 = vcmask 523264   ;;  %vm511_vm2 = vcmask 64512   ;;  %vm565_vm3 = vcmask 130112  }
  0x4a   : > { %s479_s13 = scalar_select %p478_p13, %s1385_s21, 1  ;;  %v487_v4 = vadd.f32 %v1499_v2, %v1497_v1  ;;  %498 = vadd.xlane.f32.xlu0 %v497_v3  ;;  %v500_v7 = vsel %vm496_vm0, %v1508_v5, 0.0  ;;  %v505_v9 = vld [vmem:[%s1627_s3] sm:$0xff]  ;;  %v559_v10 = vld [vmem:[%s1629_s5 + $0x8] sm:$0xff]  ;;  %v509_v16 = vand.u32 127, %v508_v13  ;;  %vm596_vm4 = vcmask 1043456  }
  0x4b   : > { %553 = vmatpush.msra.mxu1 %v505_v9  ;;  %583 = vmatpush.msra.mxu2 %v559_v10  ;;  %v506_v11 = vld [vmem:[%s1628_s4] sm:$0xff]  ;;  %vm592_vm5 = vcmask 31744   ;;  %v641_v38 = vshrl.u32 %v508_v13, 7  ;;  %s1001_s26 = sshll.u32 %s1476_s30, 3  ;;  %s767_s12 = sand.u32 1, %s1385_s21  }
  0x4c   : > { %s1003_s22 = sshll.u32 %s479_s13, 3  ;;  %488 = vadd.xlane.f32.xlu1 %v487_v4  ;;  %v558_v12 = vld [vmem:[%s1629_s5] sm:$0xff]  ;;  %529 = vmatpush.msra.mxu0 %v506_v11  ;;  %v563_v20 = vadd.s32 4294967288, %v509_v16  ;;  %s470_s19 = scalar_lea.vmem [#allocation8], %s1001_s26 }
  0x4d   : > { %584 = vmatpush.msra.mxu2 %v558_v12  ;;  %v702_v29 = vld [vmem:[%s1632_s8] sm:$0xf]  ;;  %1093 = vset.pattern.permute.xlu0 %v641_v38  ;;  %v1538_v39 = vadd.s32 8, %v641_v38  ;;  %s800_s16 = sshll.u32 %s470_s19, 4  ;;  %s1025_s11 = sshll.u32 %s1385_s21, 4  ;;  %s801_s16 = int_to_ptr.vmem [resolvable:$true] %s800_s16 }
  0x4e   : > { %s481_s9 = scalar_lea.vmem %s1662_s1, %s1003_s22  ;;  %1011 = vmatpush.msk.msrb.mxu1 %vm596_vm4, %v702_v29  ;;  %v591_v30 = vld [vmem:[%s1630_s6] sm:$0xf]  ;;  %1092 = vset.pattern.permute.xlu2 %v641_v38  ;;  %s1663_s22 = sld [smem:[#allocation23_spill]] }
  0x4f   : > { %v1510_v6 = vld [vmem:[%s481_s9] sm:$0xff]  ;;  %1007 = vmatpush.msk.msra.mxu3 %vm596_vm4, %v591_v30  ;;  %1094 = vset.pattern.permute.xlu1 %v1538_v39  ;;  %s1018_s9 = sshll.u32 %s1385_s21, 3  ;;  %s1556_s15 = scalar_lea.sflag [#allocation9], %s767_s12 }
  0x50   : > { %v492_v8 = vsel %vm491_vm1, %v1510_v6, 0.0  ;;  %v650_v31 = vld [vmem:[%s1631_s7] sm:$0xf]  ;;  %s798_s24 = scalar_lea.hbm %s1634_s10, %s1018_s9 }
  0x51   : > { %1009 = vmatpush.msk.msrb.mxu0 %vm596_vm4, %v650_v31  ;;  %s802_s27 = sshll.u32 %s798_s24, 4  ;;  %s1188_s24 = scalar_lea.hbm %s1634_s10, 16  ;;  %s803_s27 = int_to_ptr.hbm [resolvable:$true] %s802_s27 }
  0x52   : > { %501 = vadd.xlane.f32.xlu0 %v500_v7  ;;  %s1182_s9 = sshra.s32 %s803_s27, 4  ;;  %s1183_s9 = int_to_ptr.hbm [resolvable:$true] %s1182_s9 }
  0x53   : > { %s1184_s26 = scalar_lea.hbm %s1183_s9, 8  ;;  %p1189_p3 = scmp.lt.s32.totalorder %s1183_s9, %s1634_s10 }
  0x54   : > { %493 = vadd.xlane.f32.xlu1 %v492_v8  ;;  %s784_s28 = scalar_lea.hbm %s1663_s22, %s1025_s11  ;;  %p1185_p6 = scmp.ne.s32.totalorder %s1183_s9, %s1184_s26 }
  0x55   : > { %p1190_p4 = scmp.lt.s32.totalorder %s1188_s24, %s1184_s26 }
  0x56   : > { %p1186_p1 = pnand %p1185_p6, %p1416_p11 }
  0x57   : > { %p1191_p5 = por %p1190_p4, %p1189_p3 }
  0x58   : > { %p1187_p2 = pneg %p1186_p1 }
  0x5a   : > { %p1192_p7 = pnand %p1191_p5, %p1187_p2 }
  0xbd   : > { %v499_v14 = vpop.xlane.xlu0 %498 }
  0xbe   : > { %v503_v19 = vmul.f32 0.0625, %v499_v14 }
  0xbf   : > { %v489_v15 = vpop.xlane.xlu1 %488 }
  0xc0   : > { %v490_v17 = vmul.f32 0.00390625, %v489_v15  ;;  %v562_v25 = vperm.slane %v503_v19, %v509_v16 }
  0xc2   : > { %v535_v18 = vperm.slane %v490_v17, %v509_v16 }
  0xc4   : > { %1005 = vmatmul.msk.f32.vlgmr.msra.gmra.mxu1 %vm511_vm2, %v535_v18 }
  0xc5   : > { %v502_v21 = vpop.xlane.xlu0 %501 }
  0xc6   : > { %v504_v22 = vmul.f32 0.0625, %v502_v21 }
  0xc7   : > { %v494_v23 = vpop.xlane.xlu1 %493 }
  0xc8   : > { %v495_v24 = vmul.f32 0.015625, %v494_v23  ;;  %v564_v26 = vperm.slane %v504_v22, %v563_v20 }
  0xca   : > { %v510_v27 = vperm.slane %v495_v24, %v509_v16  ;;  %v566_v28 = vsel %vm565_vm3, %v564_v26, %v562_v25 }
  0xcb   : > { %1006 = vmatmul.msk.f32.vlgmr.msra.gmra.mxu2 %vm496_vm0, %v566_v28 }
  0xcc   : > { %1004 = vmatmul.msk.f32.vlgmr.msra.gmra.mxu0 %vm511_vm2, %v510_v27 }
 0x141   : > { %v555_v33 = vpop.f32.mrf.mxu1 }
 0x149   : > { %v531_v32 = vpop.f32.mrf.mxu0 }
 0x14a   : > { %v556_v34 = vadd.f32 %v555_v33, %v531_v32 }
 0x14e   : > { %v586_v35 = vpop.f32.mrf.mxu2 }
 0x14f   : > { %v589_v36 = vadd.f32 %v586_v35, %v556_v34 }
 0x151   : > { %v590_v37 = vmax.f32 %v589_v36, 0.0 }
 0x153   : > { %1008 = vmatmul.msk.f32.vlgmr.msra.gmra.mxu3 %vm592_vm5, %v590_v37  ;;  %1010 = vmatmul.msk.f32.vlgmr.msrb.gmra.mxu0 %vm592_vm5, %v590_v37 }
 0x154   : > { %1012 = vmatmul.msk.f32.vlgmr.msrb.gmra.mxu1 %vm592_vm5, %v590_v37 }
 0x1d0   : > { %v671_v40 = vpop.f32.mrf.mxu0 }
 0x1d1   : > { %v674_v41 = vsub.f32 0.0, %v671_v40  ;;  %v723_v42 = vpop.f32.mrf.mxu1 }
 0x1d2   : > { %v726_v43 = vsub.f32 0.0, %v723_v42 }
 0x1d3   : > { %v675_v44 = vmul.f32 1.442695, %v674_v41 }
 0x1d4   : > { %v727_v45 = vmul.f32 1.442695, %v726_v43 }
 0x1d5   : > { %1096 = vpow2.f32 %v675_v44 }
 0x1d6   : > { %1098 = vpow2.f32 %v727_v45  ;;  %v617_v46 = vpop.f32.mrf.mxu3 }
 0x1d7   : > { %v620_v47 = vsub.f32 0.0, %v617_v46 }
 0x1d9   : > { %v621_v48 = vmul.f32 1.442695, %v620_v47 }
 0x1db   : > { %v1097_v49 = vpop.eup %1096  ;;  %1100 = vpow2.f32 %v621_v48 }
 0x1dc   : > { %v1099_v50 = vpop.eup %1098  ;;  %v677_v51 = vadd.f32 1.0, %v1097_v49 }
 0x1dd   : > { %v729_v52 = vadd.f32 1.0, %v1099_v50 }
 0x1de   : > { %1102 = vrcp.f32 %v677_v51  ;;  %v687_v61 = vand.u32 2147483647, %v677_v51  ;;  %v689_v62 = vand.u32 2147483648, %v677_v51  ;;  %vm683_vm8 = vweird.f32 %v677_v51 }
 0x1df   : > { %1104 = vrcp.f32 %v729_v52  ;;  %v739_v63 = vand.u32 2147483647, %v729_v52  ;;  %v741_v3 = vand.u32 2147483648, %v729_v52  ;;  %vm735_vm9 = vweird.f32 %v729_v52 }
 0x1e0   : > { %vm688_vm11 = vcmp.eq.f32.partialorder %v687_v61, 8.507059e+37  ;;  %v690_v12 = vor.u32 1.1754944e-38, %v689_v62 }
 0x1e1   : > { %v1101_v53 = vpop.eup %1100  ;;  %vm740_vm13 = vcmp.eq.f32.partialorder %v739_v63, 8.507059e+37  ;;  %v742_v13 = vor.u32 1.1754944e-38, %v741_v3 }
 0x1e2   : > { %v623_v54 = vadd.f32 1.0, %v1101_v53 }
 0x1e4   : > { %v1103_v55 = vpop.eup %1102  ;;  %1106 = vrcp.f32 %v623_v54  ;;  %v633_v18 = vand.u32 2147483647, %v623_v54  ;;  %v635_v19 = vand.u32 2147483648, %v623_v54  ;;  %vm629_vm15 = vweird.f32 %v623_v54 }
 0x1e5   : > { %v1105_v56 = vpop.eup %1104  ;;  %v679_v57 = vmul.f32 %v1103_v55, %v677_v51  ;;  %vm684_vm6 = vweird.f32 %v1103_v55 }
 0x1e6   : > { %v731_v58 = vmul.f32 %v1105_v56, %v729_v52  ;;  %vm736_vm7 = vweird.f32 %v1105_v56  ;;  %vm685_vm10 = vmor %vm683_vm8, %vm684_vm6  ;;  %v636_v25 = vor.u32 1.1754944e-38, %v635_v19  ;;  %vm634_vm3 = vcmp.eq.f32.partialorder %v633_v18, 8.507059e+37 }
 0x1e7   : > { %v680_v59 = vsub.f32 1.0, %v679_v57  ;;  %vm737_vm12 = vmor %vm735_vm9, %vm736_vm7 }
 0x1e8   : > { %v732_v60 = vsub.f32 1.0, %v731_v58 }
 0x1e9   : > { %v681_v4 = vmul.f32 %v1103_v55, %v680_v59 }
 0x1ea   : > { %v1107_v7 = vpop.eup %1106  ;;  %v733_v8 = vmul.f32 %v1105_v56, %v732_v60 }
 0x1eb   : > { %v625_v9 = vmul.f32 %v1107_v7, %v623_v54  ;;  %v682_v10 = vadd.f32 %v1103_v55, %v681_v4  ;;  %vm630_vm14 = vweird.f32 %v1107_v7 }
 0x1ec   : > { %v734_v11 = vadd.f32 %v1105_v56, %v733_v8  ;;  %vm631_vm2 = vmor %vm629_vm15, %vm630_vm14 }
 0x1ed   : > { %v686_v14 = vsel %vm685_vm10, %v1103_v55, %v682_v10  ;;  %v626_v15 = vsub.f32 1.0, %v625_v9 }
 0x1ee   : > { %v738_v16 = vsel %vm737_vm12, %v1105_v56, %v734_v11  ;;  %v691_v17 = vsel %vm688_vm11, %v690_v12, %v686_v14 }
 0x1ef   : > { %v743_v20 = vsel %vm740_vm13, %v742_v13, %v738_v16  ;;  %v693_v21 = vperm.slane %v691_v17, 0  ;;  %v627_v22 = vmul.f32 %v1107_v7, %v626_v15 }
 0x1f0   : > { %v745_v23 = vperm.slane %v743_v20, 0 }
 0x1f1   : > { %698 = vperm.xlu2 %1092, %v693_v21   ;;  %v628_v24 = vadd.f32 %v1107_v7, %v627_v22 }
 0x1f2   : > { %756 = vperm.xlu1 %1094, %v745_v23   ;;  %750 = vperm.xlu0 %1093, %v745_v23  }
 0x1f3   : > { %v632_v26 = vsel %vm631_vm2, %v1107_v7, %v628_v24 }
 0x1f4   : > { %v637_v27 = vsel %vm634_vm3, %v636_v25, %v632_v26 }
 0x1f5   : > { %v639_v28 = vperm.slane %v637_v27, 0 }
 0x1f9   : > { %644 = vperm.xlu2 %1092, %v639_v28  }
 0x1fa   : > { %1095 = vset.pattern.permute.xlu0 %v1538_v39 }
 0x24b   : > { %v699_v29 = vpop.permute.xlu2 %698 }
 0x24c   : > { %v700_v30 = vmul.f32 %v699_v29, %v1510_v6 }
 0x24e   : > { %701 = vst.msk [vmem:[%s470_s19] sm:$0xff] %vm491_vm1, %v700_v30 }
 0x24f   : > { %1195 = shalt.err (!%p1192_p7)
}
 0x250   : > { %1032 = dma.vmem_to_hbm [thread:$0]  (%p1416_p11), %s801_s16, 128, %s803_s27, %s1556_s15  }
 0x251   : > { %s463_s12 = scalar_lea.vmem [#allocation7], %s1479_s17  ;;  %s788_s13 = sshll.u32 %s784_s28, 4  ;;  %s789_s13 = int_to_ptr.hbm [resolvable:$true] %s788_s13 }
 0x252   : > { %s786_s23 = sshll.u32 %s463_s12, 4  ;;  %s763_s0 = scalar_lea.sflag [#allocation4], %s1476_s30  ;;  %s787_s23 = int_to_ptr.vmem [resolvable:$true] %s786_s23 }
 0x253   : > { %v645_v6 = vpop.permute.xlu2 %644  ;;  %s1210_s9 = sshra.s32 %s789_s13, 4  ;;  %s1216_s28 = scalar_lea.hbm %s1663_s22, 32  ;;  %s1211_s9 = int_to_ptr.hbm [resolvable:$true] %s1210_s9 }
 0x254   : > { %v646_v31 = vmul.f32 %v645_v6, %v1497_v1  ;;  %v647_v32 = vmul.f32 %v645_v6, %v1499_v2  ;;  %s1212_s26 = scalar_lea.hbm %s1211_s9, 16  ;;  %p1217_p13 = scmp.lt.s32.totalorder %s1211_s9, %s1663_s22 }
 0x255   : > { %p1213_p8 = scmp.ne.s32.totalorder %s1211_s9, %s1212_s26  ;;  %p1218_p6 = scmp.lt.s32.totalorder %s1216_s28, %s1212_s26 }
 0x256   : > { %648 = vst [vmem:[%s463_s12] sm:$0xff] %v646_v31 }
 0x257   : > { %649 = vst [vmem:[%s463_s12 + $0x8] sm:$0xff] %v647_v32  ;;  %p1214_p10 = pnand %p1213_p8, %p1416_p11  ;;  %p1219_p1 = por %p1218_p6, %p1217_p13 }
 0x259   : > { %p1215_p0 = pneg %p1214_p10 }
 0x25b   : > { %p1220_p2 = pnand %p1219_p1, %p1215_p0 }
 0x25d   : > { %1223 = shalt.err (!%p1220_p2)
}
 0x25e   : > { %1031 = dma.vmem_to_hbm [thread:$0]  (%p1416_p11), %s787_s23, 256, %s789_s13, %s763_s0  }
 0x25f   : > { %s1664_s19 = sld [smem:[#allocation24_spill]]  ;;  %s477_s16 = scalar_lea.vmem [#allocation10], %s1479_s17 }
 0x260   : > { %s814_s27 = sshll.u32 %s477_s16, 4  ;;  %s815_s27 = int_to_ptr.vmem [resolvable:$true] %s814_s27 }
 0x264   : > { %v757_v1 = vpop.permute.xlu1 %756  ;;  %v751_v2 = vpop.permute.xlu0 %750 }
 0x265   : > { %s1665_s12 = smov %s1664_s19  ;;  %s813_s1 = scalar_lea.hbm %s1664_s19, %s1025_s11  ;;  %v759_v33 = vmul.f32 %v757_v1, %v1508_v5  ;;  %v758_v34 = vmul.f32 %v751_v2, %v1495_v0 }
 0x266   : > { %s816_s2 = sshll.u32 %s813_s1, 4  ;;  %s1244_s11 = scalar_lea.hbm %s1665_s12, 32  ;;  %s817_s2 = int_to_ptr.hbm [resolvable:$true] %s816_s2 }
 0x267   : > { %761 = vst.msk [vmem:[%s477_s16 + $0x8] sm:$0xff] %vm496_vm0, %v759_v33  ;;  %s1238_s21 = sshra.s32 %s817_s2, 4  ;;  %s1239_s21 = int_to_ptr.hbm [resolvable:$true] %s1238_s21 }
 0x268   : > { %760 = vst.msk [vmem:[%s477_s16] sm:$0xff] %vm496_vm0, %v758_v34  ;;  %s1240_s23 = scalar_lea.hbm %s1239_s21, 16  ;;  %p1245_p7 = scmp.lt.s32.totalorder %s1239_s21, %s1665_s12 }
 0x269   : > { %p1241_p3 = scmp.ne.s32.totalorder %s1239_s21, %s1240_s23  ;;  %p1246_p8 = scmp.lt.s32.totalorder %s1244_s11, %s1240_s23 }
 0x26b   : > { %p1242_p4 = pnand %p1241_p3, %p1416_p11  ;;  %p1247_p10 = por %p1246_p8, %p1245_p7 }
 0x26d   : > { %p1243_p5 = pneg %p1242_p4 }
 0x26f   : > { %p1248_p0 = pnand %p1247_p10, %p1243_p5 }
 0x271   : > { %1251 = shalt.err (!%p1248_p0)
}
 0x272   : > { %s1302_s9 = smov 128   ;;  %s1303_s26 = smov 8  }
 0x273   : > { %1033 = dma.vmem_to_hbm [thread:$0]  (%p1416_p11), %s815_s27, 256, %s817_s2, %s1556_s15, %s1302_s9, %s1302_s9, %s1303_s26  }
 0x274 PF: > { %s1666_s28 = sld [smem:[#allocation15_spill]]  ;;  %p1045_p13 = pnand %p990_p9, %p1420_p12 }
 0x276   : > { %p1046_p6 = pneg %p1045_p13 }
 0x27a   : > { %s831_s25 = sand.u32 1, %s1666_s28  }
 0x27b   : > { %s832_s30 = scalar_lea.sflag [#allocation4], %s831_s25 }
 0x27c   : > { %1277 = dma.done.wait (%p1046_p6), %s832_s30, 256  }
 0x27d   : > { %1279 = vsyncadd (%p1046_p6), %s832_s30, 4294967040  ;;  %s1668_s24 = sadd.s32 4294967294, %s1298_s20  }
 0x27e   : > { %s841_s19 = sand.u32 1, %s1668_s24  }
 0x27f   : > { %s842_s16 = scalar_lea.sflag [#allocation9], %s841_s19 }
 0x280   : > { %1281 = dma.done.wait (%p1046_p6), %s842_s16, 384  }
 0x281   : > { %1283 = vsyncadd (%p1046_p6), %s842_s16, 4294966912  ;;  %s1669_s20 = sld [smem:[#allocation17_spill]]  ;;  %s1672_s17 = smov %s1290_s18 }
 0x282   : > { %s1670_s2 = sld [smem:[#allocation16_spill]] }
 0x283   : > { %s1671_s19 = sld [smem:[#allocation18_spill]] }
 0x287   : > { %p31_p11 = scmp.ge.s32.totalorder %s1669_s20, 4  }
 0x288   : > { %s1673_s18 = smov %s1670_s2 }
 0x289   :  { %33 = sbr.rel (!%p31_p11) target bundleno = 15 (0xf), region = 149 }
 0x28e   :  { %858 = vsyncpa [#allocation3], 1 }
 0x28f   :  { %860 = vsyncpa [#allocation3 + $0x1], 1 }
 0x290   :  { %861 = vsyncpa [#allocation6], 1 }
 0x291   :  { %863 = vsyncpa [#allocation6 + $0x1], 1 }
 0x292   :  { %864 = vsyncpa [#allocation4], 1 }
 0x293   :  { %866 = vsyncpa [#allocation4 + $0x1], 1 }
 0x294   :  { %867 = vsyncpa [#allocation9], 1 }
 0x295   :  { %869 = vsyncpa [#allocation9 + $0x1], 1 }

</bundles_post_ra>
